<compile_context>
chip_gen: v7x
topology: tpu7x:2x2x1
jax: 0.10.0
libtpu: 0.0.40
codegen_flags: <defaults>
</compile_context>

<pallas_src>
import functools

import jax
import jax.numpy as jnp
import numpy as np
from jax.experimental import pallas as pl
from jax.experimental.pallas import tpu as pltpu


# ----------------------------- Pallas kernel ------------------------------- #
def _ffn_predict_kernel(
    x_ref,       # (B, C)           past_target
    w1_ref,      # (C, H0)
    w2_ref,      # (H0, H1)
    wh_ref,      # (H1, 2P)         fused head weight  [w3@wloc_blk | w3@wsig_blk]
    bias_ref,    # (1, H0+H1+2P)    [b1 | b2 | b_head]
    eps_ref,     # (B, S*P)         standard-normal noise, lane-dense
    out_ref,     # (B, S*P)         samples, lane-dense
    *,
    context_length: int,
    prediction_length: int,
    num_samples: int,
    h0: int,
    h1: int,
    minimum_scale: float,
):
    x = x_ref[...].astype(jnp.float32)                      # (B, C)
    B = x.shape[0]
    C = context_length
    P = prediction_length
    S = num_samples

    # ---- MeanScaler (observed_indicator == ones_like(x)) ----
    abs_sum = jnp.sum(jnp.abs(x), axis=1, keepdims=True)    # (B, 1)
    default_scale = jnp.sum(abs_sum) / (B * C)              # scalar (batch fallback)
    scale = jnp.where(abs_sum > 0.0, abs_sum / C, default_scale)
    scale = jnp.maximum(scale, minimum_scale)               # (B, 1)
    inv_scale = pl.reciprocal(scale, approx=False)          # EUP, VALU stays free
    h = x * inv_scale                                       # scaled_target

    # ---- biases (single concatenated input, sliced in-register) ----
    bias = bias_ref[...]                                    # (1, H0+H1+2P)
    b1 = bias[:, :h0]
    b2 = bias[:, h0:h0 + h1]
    bh = bias[:, h0 + h1:]

    # ---- MLP + fused distribution-args head ----
    h = jnp.maximum(
        jnp.dot(h, w1_ref[...], preferred_element_type=jnp.float32) + b1, 0.0)
    h = jnp.maximum(
        jnp.dot(h, w2_ref[...], preferred_element_type=jnp.float32) + b2, 0.0)
    y = jnp.dot(h, wh_ref[...], preferred_element_type=jnp.float32) + bh   # (B, 2P)

    loc = y[:, :P]                                          # (B, P)
    sraw = y[:, P:]                                         # (B, P)
    sigma = jnp.maximum(sraw, 0.0) + jnp.log1p(jnp.exp(-jnp.abs(sraw)))  # stable softplus

    # ---- fold target_scale into the (B,P) params before broadcasting ----
    loc_s = loc * scale                                     # (B, P)
    sigma_s = sigma * scale                                 # (B, P)

    # ---- lane-dense replication across S via a tiny 0/1 matmul on the idle MXU ----
    # rep[p, j] = 1  iff  j % P == p    => (loc_s @ rep)[b, s*P + p] = loc_s[b, p]
    col = jax.lax.broadcasted_iota(jnp.int32, (P, S * P), 1)
    row = jax.lax.broadcasted_iota(jnp.int32, (P, S * P), 0)
    rep = jnp.where((col % P) == row, 1.0, 0.0).astype(jnp.float32)       # (P, S*P)
    loc_t = jnp.dot(loc_s, rep, preferred_element_type=jnp.float32)       # (B, S*P)
    sig_t = jnp.dot(sigma_s, rep, preferred_element_type=jnp.float32)     # (B, S*P)

    # ---- sampling ----
    out_ref[...] = loc_t + sig_t * eps_ref[...]


# ------------------------------ wrapper ------------------------------------ #
def simple_feedforward_prediction(past_target, params, eps, *,
                                  prediction_length, num_parallel_samples):
    B, C = past_target.shape
    S = num_parallel_samples
    P = prediction_length
    h0 = params["w1"].shape[1]
    h1 = params["w2"].shape[1]

    eps_flat = eps.reshape(B, S * P)          # free row-major reshape, lane-dense

    vmem = pl.BlockSpec(memory_space=pltpu.MemorySpace.VMEM)  # whole array in VMEM
    kernel = functools.partial(
        _ffn_predict_kernel,
        context_length=C, prediction_length=P, num_samples=S,
        h0=h0, h1=h1, minimum_scale=1e-10)

    out_flat = pl.pallas_call(
        kernel,
        out_shape=jax.ShapeDtypeStruct((B, S * P), jnp.float32),
        in_specs=[vmem] * 6,
        out_specs=vmem,
    )(
        past_target,
        params["w1"], params["w2"],
        params["w_head"], params["bias_cat"],
        eps_flat,
    )
    return out_flat.reshape(B, S, P)


# -------------------------- parameter construction ------------------------- #
def init_params(key, context_length, num_hidden_dimensions, prediction_length):
    h0, h1, D = num_hidden_dimensions
    P = prediction_length
    ks = jax.random.split(key, 5)

    def linear(k, fan_in, fan_out):
        # deterministic PyTorch-style uniform(-1/sqrt(fan_in), 1/sqrt(fan_in))
        bound = 1.0 / float(np.sqrt(fan_in))
        kw, kb = jax.random.split(k)
        w = jax.random.uniform(kw, (fan_in, fan_out), jnp.float32, -bound, bound)
        b = jax.random.uniform(kb, (1, fan_out), jnp.float32, -bound, bound)
        return w, b

    w1, b1 = linear(ks[0], context_length, h0)
    w2, b2 = linear(ks[1], h0, h1)
    w3, b3 = linear(ks[2], h1, D * P)
    wloc, bloc = linear(ks[3], D, 1)   # Linear(D, 1) for loc
    wsig, bsig = linear(ks[4], D, 1)   # Linear(D, 1) for (pre-softplus) scale

    # Block-diagonal (P*D -> P) expansion of the per-timestep (D -> 1) projections.
    eyeP = jnp.eye(P, dtype=jnp.float32)
    wloc_blk = jnp.kron(eyeP, wloc)                 # (P*D, P)
    wsig_blk = jnp.kron(eyeP, wsig)                 # (P*D, P)
    bloc_b = jnp.broadcast_to(bloc, (1, P))
    bsig_b = jnp.broadcast_to(bsig, (1, P))

    # Fused head: Linear(H1, P*D) followed by the two linear projections (no
    # nonlinearity in between) collapses to one (H1, 2P) matmul.
    w_head = jnp.concatenate([w3 @ wloc_blk, w3 @ wsig_blk], axis=1)               # (H1, 2P)
    b_head = jnp.concatenate([b3 @ wloc_blk + bloc_b, b3 @ wsig_blk + bsig_b], 1)  # (1, 2P)
    bias_cat = jnp.concatenate([b1, b2, b_head], axis=1)                           # (1, H0+H1+2P)

    return dict(
        # fused kernel params
        w1=w1, w2=w2, w_head=w_head, bias_cat=bias_cat,
        # unfused params (used only by the pure-JAX reference)
        b1=b1, b2=b2, w3=w3, b3=b3,
        wloc_blk=wloc_blk, bloc=bloc_b, wsig_blk=wsig_blk, bsig=bsig_b)


# ------------------------------ reference ----------------------------------- #
def _reference(past_target, params, eps, prediction_length):
    x = past_target
    B, C = x.shape
    abs_sum = jnp.sum(jnp.abs(x), axis=1, keepdims=True)
    default_scale = jnp.sum(abs_sum) / (B * C)
    scale = jnp.where(abs_sum > 0.0, abs_sum / C, default_scale)
    scale = jnp.maximum(scale, 1e-10)
    h = x / scale
    h = jax.nn.relu(h @ params["w1"] + params["b1"])
    h = jax.nn.relu(h @ params["w2"] + params["b2"])
    o = h @ params["w3"] + params["b3"]
    loc = o @ params["wloc_blk"] + params["bloc"]
    sigma = jax.nn.softplus(o @ params["wsig_blk"] + params["bsig"])
    samples = loc[:, None, :] + sigma[:, None, :] * eps
    return samples * scale[:, :, None]


# --------------------------------- main ------------------------------------- #
if __name__ == "__main__":
    batch = 4
    context_length = 24
    prediction_length = 8
    num_hidden_dimensions = [32, 32, 16]
    num_parallel_samples = 100

    root = jax.random.PRNGKey(0)
    k_data, k_params, k_eps = jax.random.split(root, 3)

    past_target = jax.random.normal(k_data, (batch, context_length), jnp.float32)
    params = init_params(k_params, context_length, num_hidden_dimensions,
                         prediction_length)
    # standard-normal draws for distr.sample((num_parallel_samples,)); generated
    # in plain JAX (deterministic) and consumed inside the kernel.
    # TODO(synk): could be generated on-chip with pltpu.prng_seed/stateful_normal
    # if bit-exact parity with jax.random were not required for verification.
    eps = jax.random.normal(
        k_eps, (batch, num_parallel_samples, prediction_length), jnp.float32)

    out = simple_feedforward_prediction(
        past_target, params, eps,
        prediction_length=prediction_length,
        num_parallel_samples=num_parallel_samples)
    out = jax.block_until_ready(out)

    ref = _reference(past_target, params, eps, prediction_length)
    assert out.shape == (batch, num_parallel_samples, prediction_length)
    np.testing.assert_allclose(np.asarray(out), np.asarray(ref), rtol=1e-4, atol=1e-5)

    print("KERNEL_OK")
</pallas_src>

<mosaic_0001>
module attributes {stable_mosaic.version = 11 : i64} {
  func.func @_ffn_predict_kernel(%arg0: memref<4x24xf32, #tpu.memory_space<vmem>>, %arg1: memref<24x32xf32, #tpu.memory_space<vmem>>, %arg2: memref<32x32xf32, #tpu.memory_space<vmem>>, %arg3: memref<32x16xf32, #tpu.memory_space<vmem>>, %arg4: memref<1x80xf32, #tpu.memory_space<vmem>>, %arg5: memref<4x800xf32, #tpu.memory_space<vmem>>, %arg6: memref<4x800xf32, #tpu.memory_space<vmem>>) attributes {dimension_semantics = [], scalar_prefetch = 0 : i64, scratch_operands = 0 : i64, tpu.core_type = #tpu.core_type<tc>} {
    %c0 = arith.constant 0 : index
    %c0_0 = arith.constant 0 : index
    %0 = vector.load %arg0[%c0, %c0_0] : memref<4x24xf32, #tpu.memory_space<vmem>>, vector<4x24xf32>
    %1 = math.absf %0 : vector<4x24xf32>
    %cst = arith.constant dense<0.000000e+00> : vector<4xf32>
    %2 = vector.multi_reduction <add>, %1, %cst [1] : vector<4x24xf32> to vector<4xf32>
    %3 = vector.shape_cast %2 : vector<4xf32> to vector<4x1xf32>
    %4 = vector.shape_cast %3 : vector<4x1xf32> to vector<1x4x1xf32>
    %cst_1 = arith.constant dense<0.000000e+00> : vector<1xf32>
    %5 = vector.multi_reduction <add>, %4, %cst_1 [1, 2] : vector<1x4x1xf32> to vector<1xf32>
    %6 = vector.shape_cast %5 : vector<1xf32> to vector<1x1x1xf32>
    %7 = vector.extract %6[0, 0, 0] : f32 from vector<1x1x1xf32>
    %cst_2 = arith.constant 9.600000e+01 : f32
    %8 = arith.divf %7, %cst_2 : f32
    %cst_3 = arith.constant 0.000000e+00 : f32
    %9 = vector.broadcast %cst_3 : f32 to vector<4x1xf32>
    %10 = arith.cmpf ogt, %3, %9 : vector<4x1xf32>
    %cst_4 = arith.constant 2.400000e+01 : f32
    %11 = vector.broadcast %cst_4 : f32 to vector<4x1xf32>
    %12 = arith.divf %3, %11 : vector<4x1xf32>
    %13 = vector.broadcast %8 : f32 to vector<4x1xf32>
    %14 = arith.select %10, %12, %13 : vector<4x1xi1>, vector<4x1xf32>
    %cst_5 = arith.constant 1.000000e-10 : f32
    %15 = vector.broadcast %cst_5 : f32 to vector<4x1xf32>
    %16 = arith.maximumf %14, %15 : vector<4x1xf32>
    %17 = tpu.reciprocal %16 : vector<4x1xf32> -> vector<4x1xf32>
    %18 = vector.broadcast %17 : vector<4x1xf32> to vector<4x24xf32>
    %19 = arith.mulf %0, %18 : vector<4x24xf32>
    %c0_6 = arith.constant 0 : index
    %c0_7 = arith.constant 0 : index
    %20 = vector.load %arg4[%c0_6, %c0_7] : memref<1x80xf32, #tpu.memory_space<vmem>>, vector<1x80xf32>
    %21 = vector.extract_strided_slice %20 {offsets = [0, 0], sizes = [1, 32], strides = [1, 1]} : vector<1x80xf32> to vector<1x32xf32>
    %22 = vector.extract_strided_slice %20 {offsets = [0, 32], sizes = [1, 32], strides = [1, 1]} : vector<1x80xf32> to vector<1x32xf32>
    %23 = vector.extract_strided_slice %20 {offsets = [0, 64], sizes = [1, 16], strides = [1, 1]} : vector<1x80xf32> to vector<1x16xf32>
    %c0_8 = arith.constant 0 : index
    %c0_9 = arith.constant 0 : index
    %24 = vector.load %arg1[%c0_8, %c0_9] : memref<24x32xf32, #tpu.memory_space<vmem>>, vector<24x32xf32>
    %cst_10 = arith.constant dense<0.000000e+00> : vector<4x32xf32>
    %25 = tpu.matmul %19, %24, %cst_10 {dimension_numbers = #tpu.dot_dimension_numbers<[1], [0], [0], [1], [0, 0, 1, 1], [], []>} : vector<4x24xf32>, vector<24x32xf32>, vector<4x32xf32> -> vector<4x32xf32>
    %26 = vector.broadcast %21 : vector<1x32xf32> to vector<4x32xf32>
    %27 = arith.addf %25, %26 : vector<4x32xf32>
    %cst_11 = arith.constant 0.000000e+00 : f32
    %28 = vector.broadcast %cst_11 : f32 to vector<4x32xf32>
    %29 = arith.maximumf %27, %28 : vector<4x32xf32>
    %c0_12 = arith.constant 0 : index
    %c0_13 = arith.constant 0 : index
    %30 = vector.load %arg2[%c0_12, %c0_13] : memref<32x32xf32, #tpu.memory_space<vmem>>, vector<32x32xf32>
    %cst_14 = arith.constant dense<0.000000e+00> : vector<4x32xf32>
    %31 = tpu.matmul %29, %30, %cst_14 {dimension_numbers = #tpu.dot_dimension_numbers<[1], [0], [0], [1], [0, 0, 1, 1], [], []>} : vector<4x32xf32>, vector<32x32xf32>, vector<4x32xf32> -> vector<4x32xf32>
    %32 = vector.broadcast %22 : vector<1x32xf32> to vector<4x32xf32>
    %33 = arith.addf %31, %32 : vector<4x32xf32>
    %cst_15 = arith.constant 0.000000e+00 : f32
    %34 = vector.broadcast %cst_15 : f32 to vector<4x32xf32>
    %35 = arith.maximumf %33, %34 : vector<4x32xf32>
    %c0_16 = arith.constant 0 : index
    %c0_17 = arith.constant 0 : index
    %36 = vector.load %arg3[%c0_16, %c0_17] : memref<32x16xf32, #tpu.memory_space<vmem>>, vector<32x16xf32>
    %cst_18 = arith.constant dense<0.000000e+00> : vector<4x16xf32>
    %37 = tpu.matmul %35, %36, %cst_18 {dimension_numbers = #tpu.dot_dimension_numbers<[1], [0], [0], [1], [0, 0, 1, 1], [], []>} : vector<4x32xf32>, vector<32x16xf32>, vector<4x16xf32> -> vector<4x16xf32>
    %38 = vector.broadcast %23 : vector<1x16xf32> to vector<4x16xf32>
    %39 = arith.addf %37, %38 : vector<4x16xf32>
    %40 = vector.extract_strided_slice %39 {offsets = [0, 0], sizes = [4, 8], strides = [1, 1]} : vector<4x16xf32> to vector<4x8xf32>
    %41 = vector.extract_strided_slice %39 {offsets = [0, 8], sizes = [4, 8], strides = [1, 1]} : vector<4x16xf32> to vector<4x8xf32>
    %cst_19 = arith.constant 0.000000e+00 : f32
    %42 = vector.broadcast %cst_19 : f32 to vector<4x8xf32>
    %43 = arith.maximumf %41, %42 : vector<4x8xf32>
    %44 = math.absf %41 : vector<4x8xf32>
    %cst_20 = arith.constant 0.000000e+00 : f32
    %45 = vector.broadcast %cst_20 : f32 to vector<4x8xf32>
    %46 = arith.subf %45, %44 : vector<4x8xf32>
    %47 = math.exp %46 : vector<4x8xf32>
    %48 = math.log1p %47 : vector<4x8xf32>
    %49 = arith.addf %43, %48 : vector<4x8xf32>
    %50 = vector.broadcast %16 : vector<4x1xf32> to vector<4x8xf32>
    %51 = arith.mulf %40, %50 : vector<4x8xf32>
    %52 = vector.broadcast %16 : vector<4x1xf32> to vector<4x8xf32>
    %53 = arith.mulf %49, %52 : vector<4x8xf32>
    %54 = tpu.iota {dimensions = array<i32: 1>} : vector<8x800xi32>
    %55 = tpu.iota {dimensions = array<i32: 0>} : vector<8x800xi32>
    %c8_i32 = arith.constant 8 : i32
    %c0_i32 = arith.constant 0 : i32
    %56 = arith.cmpi eq, %c8_i32, %c0_i32 : i32
    %c1_i32 = arith.constant 1 : i32
    %57 = arith.select %56, %c1_i32, %c8_i32 : i32
    %58 = vector.broadcast %57 : i32 to vector<8x800xi32>
    %59 = arith.remsi %54, %58 : vector<8x800xi32>
    %c0_i32_21 = arith.constant 0 : i32
    %60 = vector.broadcast %c0_i32_21 : i32 to vector<8x800xi32>
    %61 = arith.cmpi ne, %59, %60 : vector<8x800xi32>
    %c0_i32_22 = arith.constant 0 : i32
    %62 = vector.broadcast %c0_i32_22 : i32 to vector<8x800xi32>
    %63 = arith.cmpi slt, %59, %62 : vector<8x800xi32>
    %c0_i32_23 = arith.constant 0 : i32
    %64 = arith.cmpi slt, %57, %c0_i32_23 : i32
    %65 = vector.broadcast %64 : i1 to vector<8x800xi1>
    %66 = vector.broadcast %65 : vector<8x800xi1> to vector<8x800xi1>
    %67 = arith.xori %63, %66 : vector<8x800xi1>
    %68 = arith.andi %67, %61 : vector<8x800xi1>
    %69 = vector.broadcast %57 : i32 to vector<8x800xi32>
    %70 = arith.addi %59, %69 : vector<8x800xi32>
    %71 = arith.select %68, %70, %59 : vector<8x800xi1>, vector<8x800xi32>
    %72 = arith.cmpi eq, %71, %55 : vector<8x800xi32>
    %cst_24 = arith.constant 1.000000e+00 : f32
    %cst_25 = arith.constant 0.000000e+00 : f32
    %73 = vector.broadcast %cst_24 : f32 to vector<8x800xf32>
    %74 = vector.broadcast %cst_25 : f32 to vector<8x800xf32>
    %75 = arith.select %72, %73, %74 : vector<8x800xi1>, vector<8x800xf32>
    %cst_26 = arith.constant dense<0.000000e+00> : vector<4x800xf32>
    %76 = tpu.matmul %51, %75, %cst_26 {dimension_numbers = #tpu.dot_dimension_numbers<[1], [0], [0], [1], [0, 0, 1, 1], [], []>} : vector<4x8xf32>, vector<8x800xf32>, vector<4x800xf32> -> vector<4x800xf32>
    %cst_27 = arith.constant dense<0.000000e+00> : vector<4x800xf32>
    %77 = tpu.matmul %53, %75, %cst_27 {dimension_numbers = #tpu.dot_dimension_numbers<[1], [0], [0], [1], [0, 0, 1, 1], [], []>} : vector<4x8xf32>, vector<8x800xf32>, vector<4x800xf32> -> vector<4x800xf32>
    %c0_28 = arith.constant 0 : index
    %c0_29 = arith.constant 0 : index
    %78 = vector.load %arg5[%c0_28, %c0_29] : memref<4x800xf32, #tpu.memory_space<vmem>>, vector<4x800xf32>
    %79 = arith.mulf %77, %78 : vector<4x800xf32>
    %80 = arith.addf %76, %79 : vector<4x800xf32>
    %c0_30 = arith.constant 0 : index
    %c0_31 = arith.constant 0 : index
    %81 = vector.load %arg6[%c0_30, %c0_31] : memref<4x800xf32, #tpu.memory_space<vmem>>, vector<4x800xf32>
    tpu.vector_store %arg6[%c0_30, %c0_31], %80 {strides = array<i32>} : memref<4x800xf32, #tpu.memory_space<vmem>>, vector<4x800xf32>,
    return
  }
}

</mosaic_0001>

<bundles_post_ra>
// kernel: tpu_custom_call.1
= control target key start
LH: loop header
LB: loop body
LE: loop exit
PB: predicated region body
PF: predicated region fallthrough
CT: control target
= control target key end

     0   :  { %11 = vsyncpa [#allocation3], 0  ;;  %s1482_s0 = inlined_call_operand.hbm [shape: f32[4,24], index: 0, kind: input, shape index: {}]   ;;  %s1483_s1 = inlined_call_operand.hbm [shape: f32[24,32], index: 1, kind: input, shape index: {}]   ;;  %s1484_s2 = inlined_call_operand.vmem [shape: f32[32,32], index: 2, kind: input, shape index: {}]   ;;  %s1485_s3 = inlined_call_operand.vmem [shape: f32[32,16], index: 3, kind: input, shape index: {}]   ;;  %s1486_s4 = inlined_call_operand.vmem [shape: f32[1,80], index: 4, kind: input, shape index: {}]   ;;  %s1487_s5 = inlined_call_operand.vmem [shape: f32[4,800], index: 5, kind: input, shape index: {}]   ;;  %s1488_s6 = inlined_call_operand.hbm [shape: f32[4,800], index: 6, kind: output, shape index: {}]  }
   0x1   :  { %12 = vsyncpa [#allocation6], 0 }
   0x2   :  { %13 = vsyncpa [#allocation4], 0  ;;  %s1273_s21 = smov [#allocation2]   ;;  %s1274_s23 = smov [#allocation5]  }
   0x3   :  { %s20_s22 = sshll.u32 %s1273_s21, 4  ;;  %s29_s24 = sshll.u32 %s1274_s23, 4  ;;  %s21_s22 = int_to_ptr.vmem [resolvable:$true] %s20_s22  ;;  %s1320_s24 = int_to_ptr.vmem [resolvable:$true] %s29_s24 }
   0x4   :  { %s1201_s27 = scalar_lea.hbm %s1482_s0, 64 }
   0x5   :  { %p1202_p0 = scmp.ne.s32.totalorder %s1482_s0, %s1201_s27  ;;  %p1205_p1 = scmp.lt.u32.totalorder %s1201_s27, %s1482_s0 }
   0x7   :  { %p1207_p2 = pnand %p1205_p1, %p1202_p0 }
   0x9   :  { %1210 = shalt.err (!%p1207_p2)
}
   0xa   :  { %s1211_s8 = scalar_lea.vmem %s21_s22, 64  ;;  %p1216_p4 = scmp.lt.s32.totalorder %s21_s22, %s21_s22 }
   0xb   :  { %p1212_p3 = scmp.ne.s32.totalorder %s21_s22, %s1211_s8  ;;  %p1217_p5 = scmp.lt.s32.totalorder %s1211_s8, %s1211_s8 }
   0xd   :  { %p1218_p6 = por %p1217_p5, %p1216_p4 }
   0xf   :  { %p1219_p7 = pnand %p1218_p6, %p1212_p3 }
  0x11   :  { %1222 = shalt.err (!%p1219_p7)
}
  0x12   :  { %23 = dma.hbm_to_vmem [thread:$0]  %s1482_s0, 64, %s21_s22, [#allocation3]  }
  0x13   :  { %s1223_s13 = scalar_lea.hbm %s1483_s1, 384 }
  0x14   :  { %p1224_p8 = scmp.ne.s32.totalorder %s1483_s1, %s1223_s13  ;;  %p1227_p9 = scmp.lt.u32.totalorder %s1223_s13, %s1483_s1 }
  0x16   :  { %p1229_p10 = pnand %p1227_p9, %p1224_p8 }
  0x18   :  { %1232 = shalt.err (!%p1229_p10)
}
  0x19   :  { %s1233_s18 = scalar_lea.vmem %s1320_s24, 384  ;;  %p1238_p12 = scmp.lt.s32.totalorder %s1320_s24, %s1320_s24 }
  0x1a   :  { %p1234_p11 = scmp.ne.s32.totalorder %s1320_s24, %s1233_s18  ;;  %p1239_p13 = scmp.lt.s32.totalorder %s1233_s18, %s1233_s18 }
  0x1c   :  { %p1240_p0 = por %p1239_p13, %p1238_p12 }
  0x1e   :  { %p1241_p1 = pnand %p1240_p0, %p1234_p11 }
  0x20   :  { %1244 = shalt.err (!%p1241_p1)
}
  0x21   :  { %s1275_s0 = smov 128   ;;  %s1276_s19 = smov 8  }
  0x22   :  { %35 = dma.hbm_to_vmem [thread:$0]  %s1483_s1, 384, %s1320_s24, [#allocation6], %s1275_s0, %s1275_s0, %s1276_s19  }
  0x23   :  { %1267 = dma.done.wait [#allocation3], 64  }
  0x24   :  { %1268 = vsyncadd [#allocation3], 4294967232 }
  0x25   :  { %1269 = dma.done.wait [#allocation6], 384  }
  0x26   :  { %1270 = vsyncadd [#allocation6], 4294966912  ;;  %v50_v0 = vld [vmem:[#allocation2] sm:$0xf]  ;;  %vm52_vm0 = vcmask 191488   ;;  %vm56_vm1 = vcmask 3072   ;;  %v342_v46 = vlaneseq }
  0x27   :  { %v51_v1 = vand.u32 2147483647, %v50_v0  ;;  %v79_v5 = vld [vmem:[#allocation5] sm:$0xff]  ;;  %v80_v6 = vld [vmem:[#allocation5 + $0x8] sm:$0xff]  ;;  %v1277_v7 = vmov 0.0|0.0   ;;  %vm1278_vm2 = vmmov 0  }
  0x28   :  { %1163 = vmatprep.subr.bf16.mxu0 %v1277_v7  ;;  %v1164_v8 = vpack.c.bf16 %v80_v6, %v79_v5  ;;  %v1279_v9 = vmov 0.0   ;;  %1166 = vmatprep.subr.bf16.mxu1 %v1277_v7  ;;  %v81_v10 = vld [vmem:[#allocation5 + $0x10] sm:$0xff]  ;;  %v163_v11 = vld [vmem:[%s1484_s2] sm:$0xff]  ;;  %v164_v12 = vld [vmem:[%s1484_s2 + $0x8] sm:$0xff]  ;;  %vm88_vm4 = vcmask 195584   ;;  %s1280_s13 = smov 96  }
  0x29   :  { %v53_v2 = vsel %vm52_vm0, %v51_v1, 0.0  ;;  %1128 = vmatprep.mubr.msk.f32.mxu0 %vm1278_vm2, %v1279_v9  ;;  %1139 = vmatprep.mubr.msk.f32.mxu1 %vm1278_vm2, %v1279_v9  ;;  %v1167_v13 = vpack.c.bf16 %v164_v12, %v163_v11  ;;  %v165_v27 = vld [vmem:[%s1484_s2 + $0x10] sm:$0xff]  ;;  %v166_v28 = vld [vmem:[%s1484_s2 + $0x18] sm:$0xff]  ;;  %v1078_v30 = vld [vmem:[%s1486_s4] ss:$0 sm:$0xff]  ;;  %vm170_vm5 = vcmask 261120  }
  0x2a   :  { %54 = vadd.xlane.f32.xlu0 %v53_v2  ;;  %1165 = vmatpush3.bf16.msra.mxu0 %v1164_v8  ;;  %v1170_v29 = vpack.c.bf16 %v166_v28, %v165_v27  ;;  %v245_v31 = vld [vmem:[%s1485_s3] sm:$0xff]  ;;  %v246_v32 = vld [vmem:[%s1485_s3 + $0x8] sm:$0xff]  ;;  %v247_v38 = vld [vmem:[%s1485_s3 + $0x10] sm:$0xff]  ;;  %s1281_s16 = smov 64   ;;  %v343_v47 = vand.u32 127, %v342_v46  ;;  %v351_v48 = vshrl.u32 %v342_v46, 7 }
  0x2b   :  { %1126 = vmatprep.subr.mxu0 %v1279_v9  ;;  %1168 = vmatpush3.bf16.msra.mxu1 %v1167_v13  ;;  %v1173_v33 = vpack.c.bf16 %v246_v32, %v245_v31  ;;  %v248_v39 = vld [vmem:[%s1485_s3 + $0x18] sm:$0xff]  ;;  %v1282_v61 = vmov 1.0   ;;  %s1283_s3 = smov 120   ;;  %vm453_vm12 = vcmask 64512   ;;  %v741_v31 = vld [vmem:[%s1487_s5 + $0x10] sm:$0xff]  ;;  %s1284_s23 = smov [#allocation7]  }
  0x2c   :  { %1169 = vmatprep.subr.bf16.mxu1 %v1277_v7  ;;  %167 = vrot.lane.b32.xlu1 %v1078_v30, %s1280_s13  ;;  %v1176_v40 = vpack.c.bf16 %v248_v39, %v247_v38  ;;  %v344_v49 = vadd.s32 128, %v343_v47  ;;  %v356_v50 = vand.u32 7, %v343_v47  ;;  %v348_v51 = vadd.s32 640, %v343_v47  ;;  %v740_v38 = vld [vmem:[%s1487_s5 + $0x8] sm:$0xff]  ;;  %s1068_s24 = sshll.u32 %s1284_s23, 4  ;;  %s1069_s24 = int_to_ptr.vmem [resolvable:$true] %s1068_s24 }
  0x2d   :  { %v346_v52 = vadd.s32 384, %v343_v47  ;;  %v347_v53 = vadd.s32 512, %v343_v47  ;;  %vm1060_vm15 = vcmask 257024   ;;  %p1250_p3 = scmp.lt.s32.totalorder %s1069_s24, %s1069_s24 }
  0x2e   :  { %1127 = vmatpush3.msra.mxu0 %v81_v10  ;;  %v363_v54 = vand.u32 7, %v344_v49  ;;  %v391_v55 = vand.u32 7, %v348_v51  ;;  %vm1390_vm6 = vcmp.eq.s32.totalorder %v356_v50, %v351_v48 }
  0x2f   :  { %1172 = vmatprep.subr.bf16.mxu0 %v1277_v7  ;;  %1171 = vmatpush3.bf16.msra.mxu1 %v1170_v29  ;;  %v377_v56 = vand.u32 7, %v346_v52  ;;  %v384_v58 = vand.u32 7, %v347_v53 }
  0x30   :  { %249 = vrot.lane.b32.xlu1 %v1078_v30, %s1281_s16  ;;  %vm437_vm7 = vcmp.eq.s32.totalorder %v363_v54, %v351_v48  ;;  %vm1394_vm8 = vcmp.eq.s32.totalorder %v391_v55, %v351_v48  ;;  %v742_v55 = vld [vmem:[%s1487_s5 + $0x18] sm:$0xf] }
  0x31   :  { %vm1398_vm9 = vcmp.eq.s32.totalorder %v377_v56, %v351_v48  ;;  %1082 = vmatprep.subr.msk.mxu1 %vm437_vm7, %v1282_v61  ;;  %vm1404_vm10 = vcmp.eq.s32.totalorder %v384_v58, %v351_v48 }
  0x9e   :  { %v168_v41 = vpop.permute.xlu1 %167 }
  0xa2   :  { %v250_v63 = vpop.permute.xlu1 %249 }
  0xb7   :  { %v55_v3 = vpop.xlane.xlu0 %54 }
  0xb8   :  { %v57_v4 = vsel %vm56_vm1, %v55_v3, 0.0  ;;  %v72_v21 = vmul.f32 0.041666668, %v55_v3  ;;  %vm70_vm3 = vcmp.gt.f32.partialorder %v55_v3, 0.0 }
  0xb9   :  { %58 = vadd.xlane.f32.xlu0 %v57_v4 }
 0x146   :  { %v59_v14 = vpop.xlane.xlu0 %58 }
 0x147   :  { %v60_v15 = vrot.slane %v59_v14, 4 }
 0x149   :  { %v61_v16 = vadd.f32 %v60_v15, %v59_v14 }
 0x14b   :  { %v62_v17 = vrot.slane %v61_v16, 2 }
 0x14d   :  { %v63_v18 = vadd.f32 %v62_v17, %v61_v16 }
 0x14f   :  { %v64_v19 = vrot.slane %v63_v18, 1 }
 0x151   :  { %v65_v20 = vadd.f32 %v64_v19, %v63_v18  ;;  %v345_v19 = vadd.s32 256, %v343_v47 }
 0x153   :  { %1178 = vpush %v65_v20  ;;  %v370_v20 = vand.u32 7, %v345_v19 }
 0x155   :  { %vm1415_vm13 = vcmp.eq.s32.totalorder %v370_v20, %v351_v48 }
 0x184   :  { %s1179_s25 = spop %1178 }
 0x185   :  { %s69_s26 = smul.f32 0.010416667, %s1179_s25  ;;  %s1245_s25 = scalar_lea.vmem %s1069_s24, 448 }
 0x186   :  { %p1246_p2 = scmp.ne.s32.totalorder %s1069_s24, %s1245_s25  ;;  %p1251_p4 = scmp.lt.s32.totalorder %s1245_s25, %s1245_s25 }
 0x187   :  { %v73_v22 = vstv %s69_s26 }
 0x188   :  { %v74_v23 = vsel %vm70_vm3, %v72_v21, %v73_v22  ;;  %v349_v21 = vadd.s32 768, %v343_v47  ;;  %p1252_p5 = por %p1251_p4, %p1250_p3 }
 0x189   :  { %v1362_v24 = vmax.f32 %v74_v23, 1e-10 }
 0x18a   :  { %v398_v23 = vand.u32 7, %v349_v21  ;;  %p1253_p6 = pnand %p1252_p5, %p1246_p2 }
 0x18b   :  { %1195 = vrcp.f32 %v1362_v24 }
 0x18c   :  { %vm1428_vm14 = vcmp.eq.s32.totalorder %v398_v23, %v351_v48 }
 0x195   :  { %v1196_v25 = vpop.eup %1195 }
 0x196   :  { %v77_v26 = vmul.f32 %v1196_v25, %v50_v0 }
 0x198   :  { %1129 = vmatmul.mubr.msk.f32.vlgmr.msra.gmra.mrb[0].mxu0 %vm88_vm4, %v77_v26 }
 0x199   :  { %1150 = vmatprep.mubr.msk.f32.mxu0 %vm1278_vm2, %v1279_v9  ;;  %1174 = vmatpush3.bf16.msra.mxu0 %v1173_v33 }
 0x19a   :  { %1175 = vmatprep.subr.bf16.mxu0 %v1277_v7 }
 0x19d   :  { %1177 = vmatpush3.bf16.msra.mxu0 %v1176_v40 }
 0x19e   :  { %1088 = vmatprep.subr.msk.mxu0 %vm1394_vm8, %v1282_v61 }
 0x26b   :  { %v158_v34 = vpop.f32.mrb[0].mxu0 }
 0x26c   :  { %v159_v35 = vadd.f32 %v1078_v30, %v158_v34  ;;  %v1130_v36 = vpop.f32.mrb[1].mxu0 }
 0x26d   :  { %v748_v36 = vcombine.high %v741_v31, %v741_v31 }
 0x26e   :  { %v162_v37 = vmax.f32 %v159_v35, 0.0 }
 0x270   :  { %1140 = vmatmul.mubr.msk.f32.vlgmr.msra.gmra.mrb[0].mxu1 %vm170_vm5, %v162_v37 }
 0x271   :  { %520 = vmatprep.mubr.f32.mxu1 %v1279_v9  ;;  %1083 = vmatpush1.msk.msra.mxu1 %vm1390_vm6, %v1282_v61 }
 0x272   :  { %1085 = vmatprep.subr.msk.mxu1 %vm1398_vm9, %v1282_v61 }
 0x343   :  { %v240_v42 = vpop.f32.mrb[0].mxu1 }
 0x344   :  { %v241_v43 = vadd.f32 %v240_v42, %v168_v41  ;;  %v1141_v44 = vpop.f32.mrb[1].mxu1 }
 0x346   :  { %v244_v45 = vmax.f32 %v241_v43, 0.0 }
 0x348   :  { %1151 = vmatmul.mubr.msk.f32.vlgmr.msra.gmra.mrb[2].mxu0 %vm170_vm5, %v244_v45  ;;  %v747_v45 = vcombine.high %v740_v38, %v740_v38 }
 0x349   :  { %662 = vmatprep.mubr.f32.mxu0 %v1279_v9  ;;  %1089 = vmatpush1.msk.msra.mxu0 %vm1404_vm10, %v1282_v61 }
 0x34a   :  { %1093 = vmatprep.subr.msk.mxu0 %vm437_vm7, %v1282_v61 }
 0x41b   :  { %v321_v0 = vpop.f32.mrb[2].mxu0 }
 0x41c   :  { %v322_v1 = vadd.f32 %v321_v0, %v250_v63  ;;  %v1152_v2 = vpop.f32.mrb[3].mxu0 }
 0x41e   :  { %v326_v3 = vand.u32 2147483647, %v322_v1  ;;  %v325_v15 = vmax.f32 %v322_v1, 0.0  ;;  %v340_v26 = vmul.f32 %v322_v1, %v1362_v24 }
 0x420   :  { %v327_v4 = vsub.f32 0.0, %v326_v3 }
 0x422   :  { %v328_v5 = vmul.f32 1.442695, %v327_v4 }
 0x424   :  { %1197 = vpow2.f32 %v328_v5 }
 0x42e   :  { %v1198_v6 = vpop.eup %1197 }
 0x42f   :  { %v330_v7 = vadd.f32 1.0, %v1198_v6  ;;  %v333_v8 = vmul.f32 -0.5, %v1198_v6  ;;  %v336_v11 = vand.u32 2147483647, %v1198_v6 }
 0x431   :  { %1199 = vlog2.f32 %v330_v7  ;;  %v334_v10 = vadd.f32 1.0, %v333_v8  ;;  %vm337_vm11 = vcmp.lt.f32.partialorder %v336_v11, 0.0004427343 }
 0x433   :  { %v335_v14 = vmul.f32 %v1198_v6, %v334_v10 }
 0x43b   :  { %v1200_v12 = vpop.eup %1199 }
 0x43c   :  { %v332_v13 = vmul.f32 0.6931472, %v1200_v12 }
 0x43e   :  { %v338_v16 = vsel %vm337_vm11, %v335_v14, %v332_v13 }
 0x43f   :  { %v339_v17 = vadd.f32 %v338_v16, %v325_v15 }
 0x441   :  { %v341_v18 = vmul.f32 %v339_v17, %v1362_v24  ;;  %v739_v24 = vld [vmem:[%s1487_s5] sm:$0xff] }
 0x442   :  { %v746_v30 = vcombine.high %v739_v24, %v739_v24 }
 0x443   :  { %451 = vrot.lane.b32.xlu0 %v341_v18, %s1283_s3 }
 0x4b5   :  { %v452_v25 = vpop.permute.xlu0 %451 }
 0x4b6   :  { %1084 = vmatmul.mubr.msk.f32.vlgmr.msra.gmra.mrb[2].mxu1 %vm453_vm12, %v452_v25  ;;  %1090 = vmatmul.mubr.msk.f32.vlgmr.msra.gmra.mrb[4].mxu0 %vm453_vm12, %v452_v25 }
 0x4b7   :  { %1086 = vmatpush1.msk.msra.mxu1 %vm1415_vm13, %v1282_v61  ;;  %591 = vmatprep.mubr.f32.mxu1 %v1279_v9 }
 0x4b8   :  { %1153 = vmatprep.subr.mxu1 %v1279_v9  ;;  %1094 = vmatpush1.msk.msra.mxu0 %vm1390_vm6, %v1282_v61 }
 0x4b9   :  { %826 = vmatprep.mubr.f32.mxu0 %v1279_v9  ;;  %1099 = vmatprep.subr.msk.mxu0 %vm1394_vm8, %v1282_v61 }
 0x4ba   :  { %1087 = vmatmul.mubr.msk.f32.vlgmr.msra.gmra.mrb[4].mxu1 %vm453_vm12, %v452_v25  ;;  %1095 = vmatmul.mubr.msk.f32.vlgmr.msra.gmra.mrb[6].mxu0 %vm453_vm12, %v340_v26 }
 0x4bb   :  { %1154 = vmatpush3.msk.msra.mxu1 %vm1428_vm14, %v1282_v61  ;;  %1155 = vmatprep.mubr.msk.f32.mxu1 %vm1278_vm2, %v1279_v9 }
 0x4bc   :  { %1096 = vmatprep.subr.msk.mxu1 %vm1398_vm9, %v1282_v61  ;;  %1100 = vmatpush1.msk.msra.mxu0 %vm1404_vm10, %v1282_v61 }
 0x4bd   :  { %968 = vmatprep.mubr.f32.mxu0 %v1279_v9 }
 0x4be   :  { %1156 = vmatmul.mubr.msk.f32.vlgmr.msra.gmra.mrb[6].mxu1 %vm453_vm12, %v452_v25  ;;  %1101 = vmatmul.mubr.msk.f32.vlgmr.msra.gmra.mrb[8].mxu0 %vm453_vm12, %v340_v26 }
 0x4bf   :  { %1097 = vmatpush1.msk.msra.mxu1 %vm1415_vm13, %v1282_v61  ;;  %897 = vmatprep.mubr.f32.mxu1 %v1279_v9 }
 0x4c0   :  { %1158 = vmatprep.subr.mxu1 %v1279_v9 }
 0x4c2   :  { %1098 = vmatmul.mubr.msk.f32.vlgmr.msra.gmra.mrb[8].mxu1 %vm453_vm12, %v340_v26 }
 0x4c3   :  { %1159 = vmatpush3.msk.msra.mxu1 %vm1428_vm14, %v1282_v61  ;;  %1160 = vmatprep.mubr.msk.f32.mxu1 %vm1278_vm2, %v1279_v9 }
 0x4c6   :  { %1161 = vmatmul.mubr.msk.f32.vlgmr.msra.gmra.mrb[10].mxu1 %vm453_vm12, %v340_v26 }
 0x589   :  { %v522_v28 = vpop.f32.mrb[2].mxu1  ;;  %v664_v29 = vpop.f32.mrb[4].mxu0 }
 0x58a   :  { %v524_v32 = vpop.f32.mrb[3].mxu1  ;;  %v666_v33 = vpop.f32.mrb[5].mxu0  ;;  %v752_v34 = vmul.f32 %v739_v24, %v522_v28  ;;  %v756_v43 = vmul.f32 %v741_v31, %v664_v29 }
 0x58b   :  { %v753_v35 = vmul.f32 %v746_v30, %v524_v32  ;;  %v757_v44 = vmul.f32 %v748_v36, %v666_v33 }
 0x58d   :  { %v593_v37 = vpop.f32.mrb[4].mxu1  ;;  %v828_v9 = vpop.f32.mrb[6].mxu0 }
 0x58e   :  { %v829_v39 = vadd.f32 %v828_v9, %v752_v34  ;;  %v595_v40 = vpop.f32.mrb[5].mxu1  ;;  %v830_v41 = vpop.f32.mrb[7].mxu0  ;;  %v754_v53 = vmul.f32 %v740_v38, %v593_v37 }
 0x58f   :  { %v831_v42 = vadd.f32 %v830_v41, %v753_v35  ;;  %v755_v54 = vmul.f32 %v747_v45, %v595_v40 }
 0x591   :  { %v1051_v46 = vcombine.low %v829_v39, %v831_v42  ;;  %v735_v47 = vpop.f32.mrb[6].mxu1  ;;  %v970_v48 = vpop.f32.mrb[8].mxu0 }
 0x592   :  { %v971_v49 = vadd.f32 %v970_v48, %v756_v43  ;;  %v1157_v50 = vpop.f32.mrb[7].mxu1  ;;  %v972_v51 = vpop.f32.mrb[9].mxu0  ;;  %v758_v61 = vmul.f32 %v742_v55, %v735_v47 }
 0x593   :  { %1057 = vst [vmem:[#allocation7] sm:$0xff] %v1051_v46  ;;  %v973_v52 = vadd.f32 %v972_v51, %v757_v44 }
 0x595   :  { %v1053_v56 = vcombine.low %v971_v49, %v973_v52  ;;  %v899_v57 = vpop.f32.mrb[8].mxu1 }
 0x596   :  { %v900_v58 = vadd.f32 %v899_v57, %v754_v53  ;;  %v901_v59 = vpop.f32.mrb[9].mxu1 }
 0x597   :  { %1059 = vst [vmem:[#allocation7 + $0x10] sm:$0xff] %v1053_v56  ;;  %v902_v60 = vadd.f32 %v901_v59, %v755_v54 }
 0x599   :  { %v1052_v62 = vcombine.low %v900_v58, %v902_v60  ;;  %v1041_v63 = vpop.f32.mrb[10].mxu1 }
 0x59a   :  { %v1042_v0 = vadd.f32 %v1041_v63, %v758_v61  ;;  %v1162_v1 = vpop.f32.mrb[11].mxu1 }
 0x59b   :  { %1058 = vst [vmem:[#allocation7 + $0x8] sm:$0xff] %v1052_v62 }
 0x59c   :  { %1061 = vst.msk [vmem:[#allocation7 + $0x18] sm:$0xf] %vm1060_vm15, %v1042_v0 }
 0x59d   :  { %1256 = shalt.err (!%p1253_p6)
}
 0x59e   :  { %s1257_s27 = scalar_lea.hbm %s1488_s6, 448 }
 0x59f   :  { %p1258_p7 = scmp.ne.s32.totalorder %s1488_s6, %s1257_s27  ;;  %p1261_p8 = scmp.lt.u32.totalorder %s1257_s27, %s1488_s6 }
 0x5a1   :  { %p1263_p9 = pnand %p1261_p8, %p1258_p7 }
 0x5a3   :  { %1266 = shalt.err (!%p1263_p9)
}
 0x5a4   :  { %1071 = dma.vmem_to_hbm [thread:$0]  %s1069_s24, 448, %s1488_s6, [#allocation4]  }
 0x5a5   :  { %1271 = dma.done.wait [#allocation4], 448  }
 0x5a6   :  { %1272 = vsyncadd [#allocation4], 4294966848 }
 0x5a7   :  { %1075 = vsyncpa [#allocation3], 1 }
 0x5a8   :  { %1076 = vsyncpa [#allocation6], 1 }
 0x5a9   :  { %1077 = vsyncpa [#allocation4], 1 }

</bundles_post_ra>
